<compile_context>
chip_gen: v7x
topology: tpu7x:2x2x1
jax: 0.10.0
libtpu: 0.0.40
codegen_flags: <defaults>
</compile_context>

<pallas_src>
import jax
import jax.numpy as jnp
from jax.experimental import pallas as pl
from jax.experimental.pallas import tpu as pltpu


# ---------------------------------------------------------------------------
# Plain-JAX glue: grouping / sampling helpers (gather-heavy, not the hot path)
# ---------------------------------------------------------------------------
def square_distance(src, dst):
    # src [B,N,C], dst [B,M,C] -> [B,N,M]
    return (jnp.sum(src * src, -1, keepdims=True)
            - 2.0 * jnp.einsum('bnc,bmc->bnm', src, dst)
            + jnp.sum(dst * dst, -1)[:, None, :])


def index_points(points, idx):
    # points [B,N,C], idx int [B, ...] -> [B, ..., C]
    B = points.shape[0]
    batch_idx = jnp.arange(B).reshape((B,) + (1,) * (idx.ndim - 1))
    return points[batch_idx, idx]


def farthest_point_sample(xyz, npoint):
    B, N, _ = xyz.shape
    centroids = jnp.zeros((B, npoint), jnp.int32)
    distance = jnp.full((B, N), 1e10, jnp.float32)
    farthest = jnp.zeros((B,), jnp.int32)  # deterministic start

    def body(i, state):
        centroids, distance, farthest = state
        centroids = centroids.at[:, i].set(farthest)
        centroid = jnp.take_along_axis(xyz, farthest[:, None, None], axis=1)  # [B,1,C]
        dist = jnp.sum((xyz - centroid) ** 2, -1)
        distance = jnp.minimum(distance, dist)
        farthest = jnp.argmax(distance, -1).astype(jnp.int32)
        return centroids, distance, farthest

    centroids, _, _ = jax.lax.fori_loop(0, npoint, body,
                                        (centroids, distance, farthest))
    return centroids


def query_ball_point(radius, nsample, xyz, new_xyz):
    B, N, _ = xyz.shape
    S = new_xyz.shape[1]
    sqrdists = square_distance(new_xyz, xyz)                       # [B,S,N]
    group_idx = jnp.broadcast_to(jnp.arange(N, dtype=jnp.int32), (B, S, N))
    group_idx = jnp.where(sqrdists > radius ** 2, N, group_idx)
    group_idx = jnp.sort(group_idx, axis=-1)[:, :, :nsample]       # [B,S,K]
    group_first = jnp.broadcast_to(group_idx[:, :, :1], (B, S, nsample))
    group_idx = jnp.where(group_idx == N, group_first, group_idx)
    return group_idx


def sample_and_group(npoint, radius, nsample, xyz, points):
    fps_idx = farthest_point_sample(xyz, npoint)                   # [B,S]
    new_xyz = index_points(xyz, fps_idx)                           # [B,S,3]
    idx = query_ball_point(radius, nsample, xyz, new_xyz)          # [B,S,K]
    grouped_xyz = index_points(xyz, idx)                           # [B,S,K,3]
    grouped_xyz_norm = grouped_xyz - new_xyz[:, :, None, :]
    if points is not None:
        grouped_points = index_points(points, idx)                 # [B,S,K,D]
        new_points = jnp.concatenate([grouped_xyz_norm, grouped_points], -1)
    else:
        new_points = grouped_xyz_norm
    return new_xyz, new_points                                     # [B,S,K,C_in]


def sample_and_group_all(xyz, points):
    B, N, C = xyz.shape
    new_xyz = jnp.zeros((B, 1, C), xyz.dtype)
    grouped_xyz = xyz[:, None, :, :]
    if points is not None:
        new_points = jnp.concatenate([grouped_xyz, points[:, None, :, :]], -1)
    else:
        new_points = grouped_xyz
    return new_xyz, new_points                                     # [B,1,N,C_in]


# ---------------------------------------------------------------------------
# Pallas kernel: fused shared-MLP (folded 1x1 conv+BN, ReLU) + max over nsample
# ---------------------------------------------------------------------------
def make_mlp_max_kernel(num_layers):
    def kernel(x_ref, *refs):
        ws = refs[:num_layers]                    # bf16 [C_in_l, C_out_l] (BN scale folded)
        shifts = refs[num_layers:2 * num_layers]  # f32  [1, C_out_l]
        out_ref = refs[2 * num_layers]            # [1, C_last, TILE_S]
        acc_ref = refs[2 * num_layers + 1]        # f32 [TILE_S, C_last] running max

        ki = pl.program_id(2)

        @pl.when(ki == 0)
        def _():
            acc_ref[...] = jnp.full_like(acc_ref, -jnp.inf)

        x = x_ref[0]                              # [TILE_S, K_TILE, C_in] bf16
        ts, kt, cin = x.shape
        h = x.reshape(ts * kt, cin)               # one big MXU matmul per layer
        for l in range(num_layers):
            w = ws[l][...]                        # bf16 (resident: constant index_map)
            sh = shifts[l][...]                   # f32
            h = jnp.dot(h, w, preferred_element_type=jnp.float32)
            h = jnp.maximum(h + sh, 0.0)          # folded BN shift + ReLU (f32)
            if l + 1 < num_layers:
                h = h.astype(jnp.bfloat16)        # bf16 inter-layer activation
        c_out = h.shape[-1]
        h = h.reshape(ts, kt, c_out)
        acc_ref[...] = jnp.maximum(acc_ref[...], jnp.max(h, axis=1))

        @pl.when(ki == pl.num_programs(2) - 1)
        def _():
            # store channels-major [C_last, TILE_S] -> PyTorch layout directly
            out_ref[0] = acc_ref[...].T.astype(out_ref.dtype)
    return kernel


def mlp_max_pallas(x, params, out_dtype=jnp.float32):
    """x: [B, S, K, C_in] -> [B, C_last, S] (fused folded-conv+BN MLP, ReLU, max over K)."""
    B, S, K, C_in = x.shape
    L = len(params)
    ws = [p[0] for p in params]       # bf16, BN scale folded into weight
    shifts = [p[1] for p in params]   # f32 [1, C_out]
    C_last = ws[-1].shape[1]
    c_max = max(w.shape[1] for w in ws)

    x = x.astype(jnp.bfloat16)        # bf16 input: halves the dominant HBM read

    # --- pad K (nsample) to a multiple of 8 by EDGE replication (max-safe) ---
    k_pad = ((K + 7) // 8) * 8
    if k_pad != K:
        x = jnp.pad(x, ((0, 0), (0, 0), (0, k_pad - K), (0, 0)), mode='edge')

    # --- VMEM byte budget -> cap on M = tile_s * tile_k (v7x 64 MiB safe) ---
    # per-row live bytes: double-buffered bf16 x block + peak f32 layer output
    # + bf16 inter-layer activation + f32 running-max accumulator.
    per_row_bytes = (2 * 2 * C_in) + 4 * c_max + 2 * c_max + 4 * C_last
    m_cap = int(min(8192, max(512, (32 << 20) // per_row_bytes)))

    # --- S tiling (output lane dim): single tile if small, else 256 ---
    if S <= 256:
        tile_s, s_pad = S, S
    else:
        tile_s = 256
        s_pad = pl.cdiv(S, tile_s) * tile_s
    if s_pad != S:
        x = jnp.pad(x, ((0, 0), (0, s_pad - S), (0, 0), (0, 0)))

    # --- K tiling: prefer the full (padded) K so the K grid axis collapses ---
    if tile_s * k_pad <= m_cap or k_pad <= 8:
        tile_k = k_pad
    else:
        tile_k = 8
        t = 8
        while t <= k_pad:
            if k_pad % t == 0 and tile_s * t <= m_cap:
                tile_k = t
            t += 8

    grid = (B, s_pad // tile_s, k_pad // tile_k)

    in_specs = [pl.BlockSpec((1, tile_s, tile_k, C_in),
                             lambda b, si, ki: (b, si, ki, 0))]
    in_specs += [pl.BlockSpec(w.shape, lambda b, si, ki: (0, 0)) for w in ws]
    in_specs += [pl.BlockSpec(s.shape, lambda b, si, ki: (0, 0)) for s in shifts]

    out = pl.pallas_call(
        make_mlp_max_kernel(L),
        out_shape=jax.ShapeDtypeStruct((B, C_last, s_pad), out_dtype),
        grid=grid,
        in_specs=in_specs,
        out_specs=pl.BlockSpec((1, C_last, tile_s),
                               lambda b, si, ki: (b, 0, si)),
        scratch_shapes=[pltpu.VMEM((tile_s, C_last), jnp.float32)],
        compiler_params=pltpu.CompilerParams(
            dimension_semantics=("parallel", "parallel", "arbitrary"),
            vmem_limit_bytes=48 * 1024 * 1024),
    )(x, *ws, *shifts)

    if s_pad != S:
        out = out[:, :, :S]
    return out


def mlp_max_ref(x, params):
    """Pure-JAX reference mirroring the kernel math (bf16 dots, f32 accumulate)."""
    L = len(params)
    h = x.astype(jnp.bfloat16)
    for l, (w, sh) in enumerate(params):
        h = jnp.einsum('bskc,cd->bskd', h, w, preferred_element_type=jnp.float32)
        h = jnp.maximum(h + sh, 0.0)
        if l + 1 < L:
            h = h.astype(jnp.bfloat16)
    return jnp.transpose(jnp.max(h, axis=2), (0, 2, 1))   # [B, C_last, S]


# ---------------------------------------------------------------------------
# Module: parameters + forward
# ---------------------------------------------------------------------------
def init_params(key, in_channel, mlp):
    """Deterministic Conv2d(1x1)+BatchNorm2d params, folded for inference."""
    params = []
    last = in_channel
    eps = 1e-5
    for out_c in mlp:
        key, k1, k2, k3, k4, k5, k6 = jax.random.split(key, 7)
        W = 0.1 * jax.random.normal(k1, (out_c, last), jnp.float32)   # [C_out, C_in]
        b = 0.1 * jax.random.normal(k2, (out_c,), jnp.float32)
        gamma = 1.0 + 0.1 * jax.random.normal(k3, (out_c,), jnp.float32)
        beta = 0.1 * jax.random.normal(k4, (out_c,), jnp.float32)
        rmean = 0.1 * jax.random.normal(k5, (out_c,), jnp.float32)
        rvar = 1.0 + 0.1 * jax.random.uniform(k6, (out_c,), jnp.float32)
        scale = gamma / jnp.sqrt(rvar + eps)
        shift = scale * (b - rmean) + beta
        # Fold BN scale into the weight; keep only the shift for the kernel.
        w_folded = (W.T * scale[None, :]).astype(jnp.bfloat16)       # [C_in, C_out]
        params.append((w_folded, shift.reshape(1, out_c).astype(jnp.float32)))
        last = out_c
    return params


def pointnet_set_abstraction(xyz, points, params, npoint, radius, nsample,
                             group_all):
    """xyz: [B, 3, N], points: [B, D, N] or None.
    Returns new_xyz [B, 3, S], new_points [B, C_last, S]."""
    xyz_t = jnp.transpose(xyz, (0, 2, 1))
    pts_t = None if points is None else jnp.transpose(points, (0, 2, 1))

    if group_all:
        new_xyz, new_points = sample_and_group_all(xyz_t, pts_t)
    else:
        new_xyz, new_points = sample_and_group(npoint, radius, nsample,
                                               xyz_t, pts_t)
    # new_points is already in the kernel's natural [B, S, K, C_in] layout;
    # hand it over in bf16 (early layers are DMA-bound, not MXU-bound).
    feat = mlp_max_pallas(new_points.astype(jnp.bfloat16), params)   # [B, C_last, S]
    new_xyz_out = jnp.transpose(new_xyz, (0, 2, 1))                  # [B, 3, S]
    return new_xyz_out, feat


if __name__ == "__main__":
    key = jax.random.PRNGKey(0)
    k_xyz, k_pts, k_par = jax.random.split(key, 3)

    B, N, D = 2, 16, 4
    npoint, radius, nsample = 8, 0.4, 8
    in_channel = D + 3
    mlp = [16, 32]

    xyz = jax.random.uniform(k_xyz, (B, 3, N), jnp.float32)        # [B, 3, N]
    points = jax.random.normal(k_pts, (B, D, N), jnp.float32)      # [B, D, N]
    params = init_params(k_par, in_channel, mlp)

    fwd = jax.jit(pointnet_set_abstraction,
                  static_argnames=("npoint", "nsample", "group_all"))

    # group_all = False path
    new_xyz, new_feat = fwd(xyz, points, params, npoint=npoint, radius=radius,
                            nsample=nsample, group_all=False)
    jax.block_until_ready(new_feat)
    assert new_xyz.shape == (B, 3, npoint)
    assert new_feat.shape == (B, mlp[-1], npoint)

    # one-time correctness check of the fused hot path (test harness only)
    xyz_t = jnp.transpose(xyz, (0, 2, 1))
    pts_t = jnp.transpose(points, (0, 2, 1))
    _, grouped = sample_and_group(npoint, radius, nsample, xyz_t, pts_t)
    ref_feat = mlp_max_ref(grouped, params)
    assert jnp.allclose(new_feat, ref_feat, rtol=1e-2, atol=1e-2), "kernel mismatch"

    # group_all = True path (S = 1, K = N)
    new_xyz_a, new_feat_a = fwd(xyz, points, params, npoint=npoint, radius=radius,
                                nsample=nsample, group_all=True)
    jax.block_until_ready(new_feat_a)
    assert new_xyz_a.shape == (B, 3, 1)
    assert new_feat_a.shape == (B, mlp[-1], 1)

    # correctness of the group_all path too
    _, grouped_all = sample_and_group_all(xyz_t, pts_t)
    ref_feat_a = mlp_max_ref(grouped_all, params)
    assert jnp.allclose(new_feat_a, ref_feat_a, rtol=1e-2, atol=1e-2), "group_all mismatch"

    print("KERNEL_OK")
</pallas_src>

<mosaic_0001>
module attributes {stable_mosaic.version = 11 : i64} {
  func.func @kernel(%arg0: i32, %arg1: i32, %arg2: i32, %arg3: memref<1x8x8x7xbf16, #tpu.memory_space<vmem>>, %arg4: memref<7x16xbf16, #tpu.memory_space<vmem>>, %arg5: memref<16x32xbf16, #tpu.memory_space<vmem>>, %arg6: memref<1x16xf32, #tpu.memory_space<vmem>>, %arg7: memref<1x32xf32, #tpu.memory_space<vmem>>, %arg8: memref<1x32x8xf32, #tpu.memory_space<vmem>>, %arg9: memref<8x32xf32, #tpu.memory_space<vmem>>) attributes {dimension_semantics = [#tpu.dimension_semantics<parallel>, #tpu.dimension_semantics<parallel>, #tpu.dimension_semantics<arbitrary>], iteration_bounds = array<i64: 2, 1, 1>, scalar_prefetch = 0 : i64, scratch_operands = 1 : i64, tpu.core_type = #tpu.core_type<tc>, window_params = [{transform_indices = @transform_0, window_bounds = array<i64: 1, 8, 8, 7>}, {pipeline_mode = #tpu.pipeline_mode<synchronous>, transform_indices = @transform_1, window_bounds = array<i64: 7, 16>}, {pipeline_mode = #tpu.pipeline_mode<synchronous>, transform_indices = @transform_2, window_bounds = array<i64: 16, 32>}, {pipeline_mode = #tpu.pipeline_mode<synchronous>, transform_indices = @transform_3, window_bounds = array<i64: 1, 16>}, {pipeline_mode = #tpu.pipeline_mode<synchronous>, transform_indices = @transform_4, window_bounds = array<i64: 1, 32>}, {transform_indices = @transform_5, window_bounds = array<i64: 1, 32, 8>}]} {
    %c0_i32 = arith.constant 0 : i32
    %0 = arith.cmpi eq, %arg2, %c0_i32 : i32
    %1 = arith.extui %0 : i1 to i32
    %c0_i32_0 = arith.constant 0 : i32
    %2 = arith.cmpi ne, %1, %c0_i32_0 : i32
    scf.if %2 {
      %cst_22 = arith.constant 0xFF800000 : f32
      %29 = vector.broadcast %cst_22 : f32 to vector<8x32xf32>
      %c0_23 = arith.constant 0 : index
      %c0_24 = arith.constant 0 : index
      %30 = vector.load %arg9[%c0_23, %c0_24] : memref<8x32xf32, #tpu.memory_space<vmem>>, vector<8x32xf32>
      tpu.vector_store %arg9[%c0_23, %c0_24], %29 {strides = array<i32>} : memref<8x32xf32, #tpu.memory_space<vmem>>, vector<8x32xf32>,
    } else {
    }
    %c0 = arith.constant 0 : index
    %c0_1 = arith.constant 0 : index
    %c0_2 = arith.constant 0 : index
    %c0_3 = arith.constant 0 : index
    %3 = vector.load %arg3[%c0, %c0_1, %c0_2, %c0_3] : memref<1x8x8x7xbf16, #tpu.memory_space<vmem>>, vector<1x8x8x7xbf16>
    %4 = vector.shape_cast %3 : vector<1x8x8x7xbf16> to vector<8x8x7xbf16>
    %5 = vector.shape_cast %4 : vector<8x8x7xbf16> to vector<64x7xbf16>
    %c0_4 = arith.constant 0 : index
    %c0_5 = arith.constant 0 : index
    %6 = vector.load %arg4[%c0_4, %c0_5] : memref<7x16xbf16, #tpu.memory_space<vmem>>, vector<7x16xbf16>
    %c0_6 = arith.constant 0 : index
    %c0_7 = arith.constant 0 : index
    %7 = vector.load %arg6[%c0_6, %c0_7] : memref<1x16xf32, #tpu.memory_space<vmem>>, vector<1x16xf32>
    %cst = arith.constant dense<0.000000e+00> : vector<64x16xf32>
    %8 = tpu.matmul %5, %6, %cst {dimension_numbers = #tpu.dot_dimension_numbers<[1], [0], [0], [1], [0, 0, 1, 1], [], []>} : vector<64x7xbf16>, vector<7x16xbf16>, vector<64x16xf32> -> vector<64x16xf32>
    %9 = vector.broadcast %7 : vector<1x16xf32> to vector<64x16xf32>
    %10 = arith.addf %8, %9 : vector<64x16xf32>
    %cst_8 = arith.constant 0.000000e+00 : f32
    %11 = vector.broadcast %cst_8 : f32 to vector<64x16xf32>
    %12 = arith.maximumf %10, %11 : vector<64x16xf32>
    %13 = arith.truncf %12 : vector<64x16xf32> to vector<64x16xbf16>
    %c0_9 = arith.constant 0 : index
    %c0_10 = arith.constant 0 : index
    %14 = vector.load %arg5[%c0_9, %c0_10] : memref<16x32xbf16, #tpu.memory_space<vmem>>, vector<16x32xbf16>
    %c0_11 = arith.constant 0 : index
    %c0_12 = arith.constant 0 : index
    %15 = vector.load %arg7[%c0_11, %c0_12] : memref<1x32xf32, #tpu.memory_space<vmem>>, vector<1x32xf32>
    %cst_13 = arith.constant dense<0.000000e+00> : vector<64x32xf32>
    %16 = tpu.matmul %13, %14, %cst_13 {dimension_numbers = #tpu.dot_dimension_numbers<[1], [0], [0], [1], [0, 0, 1, 1], [], []>} : vector<64x16xbf16>, vector<16x32xbf16>, vector<64x32xf32> -> vector<64x32xf32>
    %17 = vector.broadcast %15 : vector<1x32xf32> to vector<64x32xf32>
    %18 = arith.addf %16, %17 : vector<64x32xf32>
    %cst_14 = arith.constant 0.000000e+00 : f32
    %19 = vector.broadcast %cst_14 : f32 to vector<64x32xf32>
    %20 = arith.maximumf %18, %19 : vector<64x32xf32>
    %21 = vector.shape_cast %20 : vector<64x32xf32> to vector<8x8x32xf32>
    %c0_15 = arith.constant 0 : index
    %c0_16 = arith.constant 0 : index
    %22 = vector.load %arg9[%c0_15, %c0_16] : memref<8x32xf32, #tpu.memory_space<vmem>>, vector<8x32xf32>
    %cst_17 = arith.constant dense<0xFF800000> : vector<8x32xf32>
    %23 = vector.multi_reduction <maximumf>, %21, %cst_17 [1] : vector<8x8x32xf32> to vector<8x32xf32>
    %24 = arith.maximumf %22, %23 : vector<8x32xf32>
    %c0_18 = arith.constant 0 : index
    %c0_19 = arith.constant 0 : index
    %25 = vector.load %arg9[%c0_18, %c0_19] : memref<8x32xf32, #tpu.memory_space<vmem>>, vector<8x32xf32>
    tpu.vector_store %arg9[%c0_18, %c0_19], %24 {strides = array<i32>} : memref<8x32xf32, #tpu.memory_space<vmem>>, vector<8x32xf32>,
    %c0_i32_20 = arith.constant 0 : i32
    %26 = arith.cmpi eq, %arg2, %c0_i32_20 : i32
    %27 = arith.extui %26 : i1 to i32
    %c0_i32_21 = arith.constant 0 : i32
    %28 = arith.cmpi ne, %27, %c0_i32_21 : i32
    scf.if %28 {
      %c0_22 = arith.constant 0 : index
      %c0_23 = arith.constant 0 : index
      %29 = vector.load %arg9[%c0_22, %c0_23] : memref<8x32xf32, #tpu.memory_space<vmem>>, vector<8x32xf32>
      %30 = tpu.transpose %29, [1, 0] : vector<8x32xf32> -> vector<32x8xf32>
      %c0_24 = arith.constant 0 : index
      %c0_25 = arith.constant 0 : index
      %c0_26 = arith.constant 0 : index
      %31 = vector.load %arg8[%c0_24, %c0_25, %c0_26] : memref<1x32x8xf32, #tpu.memory_space<vmem>>, vector<1x32x8xf32>
      %32 = vector.shape_cast %31 : vector<1x32x8xf32> to vector<32x8xf32>
      %33 = vector.shape_cast %30 : vector<32x8xf32> to vector<1x32x8xf32>
      tpu.vector_store %arg8[%c0_24, %c0_25, %c0_26], %33 {strides = array<i32>} : memref<1x32x8xf32, #tpu.memory_space<vmem>>, vector<1x32x8xf32>,
    } else {
    }
    return
  }
  func.func @transform_0(%arg0: i32, %arg1: i32, %arg2: i32) -> (i32, i32, i32, i32) {
    %c0_i32 = arith.constant 0 : i32
    %c0_i32_0 = arith.constant 0 : i32
    return %arg0, %arg1, %arg2, %c0_i32 : i32, i32, i32, i32
  }
  func.func @transform_1(%arg0: i32, %arg1: i32, %arg2: i32) -> (i32, i32) {
    %c0_i32 = arith.constant 0 : i32
    %c0_i32_0 = arith.constant 0 : i32
    %c0_i32_1 = arith.constant 0 : i32
    return %c0_i32, %c0_i32_0 : i32, i32
  }
  func.func @transform_2(%arg0: i32, %arg1: i32, %arg2: i32) -> (i32, i32) {
    %c0_i32 = arith.constant 0 : i32
    %c0_i32_0 = arith.constant 0 : i32
    %c0_i32_1 = arith.constant 0 : i32
    return %c0_i32, %c0_i32_0 : i32, i32
  }
  func.func @transform_3(%arg0: i32, %arg1: i32, %arg2: i32) -> (i32, i32) {
    %c0_i32 = arith.constant 0 : i32
    %c0_i32_0 = arith.constant 0 : i32
    %c0_i32_1 = arith.constant 0 : i32
    return %c0_i32, %c0_i32_0 : i32, i32
  }
  func.func @transform_4(%arg0: i32, %arg1: i32, %arg2: i32) -> (i32, i32) {
    %c0_i32 = arith.constant 0 : i32
    %c0_i32_0 = arith.constant 0 : i32
    %c0_i32_1 = arith.constant 0 : i32
    return %c0_i32, %c0_i32_0 : i32, i32
  }
  func.func @transform_5(%arg0: i32, %arg1: i32, %arg2: i32) -> (i32, i32, i32) {
    %c0_i32 = arith.constant 0 : i32
    %c0_i32_0 = arith.constant 0 : i32
    return %arg0, %c0_i32, %arg1 : i32, i32, i32
  }
}

</mosaic_0001>

<bundles_post_ra>
// kernel: custom-call.8
= control target key start
LH: loop header
LB: loop body
LE: loop exit
PB: predicated region body
PF: predicated region fallthrough
CT: control target
= control target key end

     0   :  { %s6_s0 = inlined_call_operand.vmem [shape: f32[2,16], index: 0, kind: output, shape index: {}]  }

// kernel: pointnet_set_abstraction.1
= control target key start
LH: loop header
LB: loop body
LE: loop exit
PB: predicated region body
PF: predicated region fallthrough
CT: control target
= control target key end

     0   :  { %s879_s18 = smov 0   ;;  %s881_s19 = smov 0   ;;  %s945_s0 = inlined_call_operand.vmem [shape: bf16[2,8,8,7], index: 0, kind: input, shape index: {}]   ;;  %s946_s1 = inlined_call_operand.vmem [shape: bf16[7,16], index: 1, kind: input, shape index: {}]   ;;  %s947_s2 = inlined_call_operand.vmem [shape: bf16[16,32], index: 2, kind: input, shape index: {}]   ;;  %s948_s3 = inlined_call_operand.vmem [shape: f32[1,16], index: 3, kind: input, shape index: {}]   ;;  %s949_s4 = inlined_call_operand.vmem [shape: f32[1,32], index: 4, kind: input, shape index: {}]   ;;  %s950_s5 = inlined_call_operand.vmem [shape: f32[2,32,8], index: 5, kind: output, shape index: {}]  }
   0x1   :  { %s883_s20 = smov 0  }
   0x2 LB: > { %s34_s21 = sadd.s32 1, %s841_s19  ;;  %p737_p0 = scmp.ge.s32.totalorder %s845_s20, 1  ;;  %s845_s20 = sphi %s883_s20, %s15_s20   ;;  %s841_s19 = sphi %s881_s19, %s952_s19   ;;  %s837_s18 = sphi %s879_s18, %s951_s18  }
   0x3   : > { %p36_p1 = scmp.ge.s32.totalorder %s34_s21, 2  ;;  %p220_p2 = scmp.lt.s32.totalorder %s845_s20, 3 }
   0x5   : > { %s954_s21 = smov (%p36_p1, %s34_s21), 0  ;;  %p221_p3 = pnand %p737_p0, %p220_p2 }
   0x6   : > { %v294_v0 = vld [vmem:[%s946_s1] sm:$0xf] (!%p221_p3)  ;;  %vm335_vm0 = vcmask (!%p221_p3), 1042432   ;;  %vm336_vm1 = vcmask (!%p221_p3), 1043456   ;;  %p259_p4 = scmp.lt.s32.totalorder (!%p221_p3), %s837_s18, 1  ;;  %v847_v1 = vmov (!%p221_p3), 65535  }
   0x7   : > { %224 = sbr.rel (%p221_p3) target bundleno = 638 (0x27e), region = 40  ;;  %v337_v2 = vsel (!%p221_p3), %vm335_vm0, 4294967295, %v847_v1  ;;  %vm322_vm2 = vcmask (!%p221_p3), 56320   ;;  %v822_v9 = vld [vmem:[%s947_s2] sm:$0xff] (!%p221_p3)   ;;  %vm434_vm3 = vcmask (!%p221_p3), 130048   ;;  %vm284_vm4 = vcmask (!%p221_p3), 261120  }
   0x8   : > { %v338_v3 = vsel (!%p221_p3), %vm336_vm1, %v337_v2, 0  ;;  %781 = vmatprep.subr.bf16.mxu1 (!%p221_p3), %v822_v9  ;;  %v742_v10 = vld [vmem:[%s948_s3] ss:$0 sm:$0xff] (!%p221_p3)  ;;  %v848_v39 = vmov (!%p221_p3), -inf   ;;  %vm586_vm5 = vcmask (!%p221_p3), 1041409   ;;  %vm588_vm6 = vcmask (!%p221_p3), 1042434  }
   0x9   : > { %v340_v4 = vand.u32 (!%p221_p3), %v338_v3, %v294_v0  ;;  %782 = vmatpush3.bf16.msra.mxu1 (!%p221_p3), %v822_v9  ;;  %285 = vst.msk [vmem:[#allocation2] sm:$0xff] (!%p221_p3), %vm284_vm4, %v848_v39  ;;  %v751_v40 = vld [vmem:[%s949_s4] ss:$0 sm:$0xff] (!%p221_p3)  ;;  %vm590_vm7 = vcmask (!%p221_p3), 1043459   ;;  %vm592_vm8 = vcmask (!%p221_p3), 1044484   ;;  %vm594_vm9 = vcmask (!%p221_p3), 1045509  }
   0xa   : > { %vm596_vm10 = vcmask (!%p221_p3), 1046534   ;;  %vm598_vm11 = vcmask (!%p221_p3), 1047559   ;;  %vm639_vm12 = vcmask (!%p221_p3), 64512  }
   0xb   : > { %771 = vmatprep.subr.bf16.mxu0 (!%p221_p3), %v340_v4 }
   0xc   : > { %772 = vmatpush3.bf16.msra.mxu0 (!%p221_p3), %v340_v4 }
   0xe   : > { %s956_s18 = smov (!%p259_p4, %s837_s18), 1 }
   0xf   : > { %s759_s24 = sshll.u32 %s956_s18, 5 }
  0x10   : > { %s269_s27 = scalar_lea.vmem %s945_s0, %s759_s24  ;;  %s278_s11 = scalar_lea.vmem %s950_s5, %s759_s24 }
  0x11   : > { %v818_v5 = vld [vmem:[%s269_s27] sm:$0xff]   ;;  %v819_v6 = vld [vmem:[%s269_s27 + $0x8] sm:$0xff]   ;;  %v820_v7 = vld [vmem:[%s269_s27 + $0x10] sm:$0xff]  }
  0x12   : > { %773 = vmatprep.mubr.msk.bf16.mxu0 %vm322_vm2, %v818_v5  ;;  %v821_v8 = vld [vmem:[%s269_s27 + $0x18] sm:$0xff]  }
  0x13   : > { %774 = vmatmul.mubr.msk.bf16.vlgmr.msra.gmra.mrb[0].mxu0 %vm322_vm2, %v819_v6 }
  0x14   : > { %777 = vmatprep.mubr.msk.bf16.mxu0 %vm322_vm2, %v820_v7 }
  0x1b   : > { %778 = vmatmul.mubr.msk.bf16.gmra.mrb[4].mxu0 %vm322_vm2, %v821_v8 }
  0xe6   : > { %v775_v11 = vpop.f32.mrb[0].mxu0 }
  0xe7   : > { %v385_v12 = vadd.f32 %v775_v11, %v742_v10  ;;  %v376_v13 = vpop.f32.mrb[1].mxu0 }
  0xe8   : > { %v377_v14 = vadd.f32 %v742_v10, %v376_v13  ;;  %v776_v15 = vpop.f32.mrb[2].mxu0 }
  0xe9   : > { %v388_v16 = vadd.f32 %v776_v15, %v742_v10  ;;  %v379_v17 = vpop.f32.mrb[3].mxu0  ;;  %v409_v19 = vmax.f32 %v385_v12, 0.0 }
  0xea   : > { %v380_v18 = vadd.f32 %v742_v10, %v379_v17  ;;  %v407_v21 = vmax.f32 %v377_v14, 0.0 }
  0xeb   : > { %v410_v20 = vmax.f32 %v388_v16, 0.0 }
  0xec   : > { %v408_v22 = vmax.f32 %v380_v18, 0.0 }
  0xed   : > { %v416_v23 = vpack.c.bf16 %v410_v20, %v409_v19 }
  0xee   : > { %v779_v24 = vpop.f32.mrb[4].mxu0  ;;  %v415_v25 = vpack.c.bf16 %v408_v22, %v407_v21 }
  0xef   : > { %v401_v26 = vadd.f32 %v779_v24, %v742_v10  ;;  %v392_v27 = vpop.f32.mrb[5].mxu0 }
  0xf0   : > { %v393_v28 = vadd.f32 %v742_v10, %v392_v27  ;;  %v780_v29 = vpop.f32.mrb[6].mxu0  ;;  %783 = vmatprep.mubr.msk.bf16.mxu1 %vm434_vm3, %v415_v25 }
  0xf1   : > { %v404_v30 = vadd.f32 %v780_v29, %v742_v10  ;;  %v395_v31 = vpop.f32.mrb[7].mxu0  ;;  %784 = vmatmul.mubr.msk.bf16.vlgmr.msra.gmra.mrb[0].mxu1 %vm434_vm3, %v416_v23  ;;  %v413_v33 = vmax.f32 %v401_v26, 0.0 }
  0xf2   : > { %v396_v32 = vadd.f32 %v742_v10, %v395_v31  ;;  %v411_v35 = vmax.f32 %v393_v28, 0.0 }
  0xf3   : > { %v414_v34 = vmax.f32 %v404_v30, 0.0 }
  0xf4   : > { %v412_v36 = vmax.f32 %v396_v32, 0.0 }
  0xf5   : > { %v418_v37 = vpack.c.bf16 %v414_v34, %v413_v33 }
  0xf6   : > { %v417_v38 = vpack.c.bf16 %v412_v36, %v411_v35 }
  0xf8   : > { %787 = vmatprep.mubr.msk.bf16.mxu1 %vm434_vm3, %v417_v38 }
  0xf9   : > { %788 = vmatmul.mubr.msk.bf16.gmra.mrb[4].mxu1 %vm434_vm3, %v418_v37 }
 0x1c4   : > { %v785_v41 = vpop.f32.mrb[0].mxu1 }
 0x1c5   : > { %v490_v42 = vadd.f32 %v785_v41, %v751_v40  ;;  %v481_v43 = vpop.f32.mrb[1].mxu1 }
 0x1c6   : > { %v482_v44 = vadd.f32 %v751_v40, %v481_v43  ;;  %v786_v45 = vpop.f32.mrb[2].mxu1 }
 0x1c7   : > { %v514_v46 = vmax.f32 %v490_v42, 0.0  ;;  %v493_v47 = vadd.f32 %v786_v45, %v751_v40  ;;  %v484_v48 = vpop.f32.mrb[3].mxu1 }
 0x1c8   : > { %v512_v49 = vmax.f32 %v482_v44, 0.0  ;;  %v485_v50 = vadd.f32 %v751_v40, %v484_v48 }
 0x1c9   : > { %v536_v51 = vsel %vm284_vm4, %v514_v46, -inf  ;;  %v515_v52 = vmax.f32 %v493_v47, 0.0 }
 0x1ca   : > { %v537_v53 = vrot.slane %v536_v51, 4  ;;  %v522_v54 = vsel %vm284_vm4, %v512_v49, -inf  ;;  %v513_v55 = vmax.f32 %v485_v50, 0.0 }
 0x1cb   : > { %v523_v56 = vrot.slane %v522_v54, 4  ;;  %v543_v57 = vsel %vm284_vm4, %v515_v52, -inf }
 0x1cc   : > { %v538_v58 = vmax.f32 %v536_v51, %v537_v53  ;;  %v544_v59 = vrot.slane %v543_v57, 4  ;;  %v529_v60 = vsel %vm284_vm4, %v513_v55, -inf  ;;  %v789_v61 = vpop.f32.mrb[4].mxu1 }
 0x1cd   : > { %v524_v62 = vmax.f32 %v522_v54, %v523_v56  ;;  %v530_v63 = vrot.slane %v529_v60, 4  ;;  %v506_v0 = vadd.f32 %v789_v61, %v751_v40  ;;  %v497_v1 = vpop.f32.mrb[5].mxu1  ;;  %v520_v61 = vld [vmem:[#allocation2] sm:$0xff] }
 0x1ce   : > { %v539_v2 = vrot.slane %v538_v58, 2  ;;  %v545_v3 = vmax.f32 %v543_v57, %v544_v59  ;;  %v498_v4 = vadd.f32 %v751_v40, %v497_v1  ;;  %v790_v5 = vpop.f32.mrb[6].mxu1 }
 0x1cf   : > { %v525_v6 = vrot.slane %v524_v62, 2  ;;  %v531_v7 = vmax.f32 %v529_v60, %v530_v63  ;;  %v518_v8 = vmax.f32 %v506_v0, 0.0  ;;  %v509_v9 = vadd.f32 %v790_v5, %v751_v40  ;;  %v500_v10 = vpop.f32.mrb[7].mxu1 }
 0x1d0   : > { %v540_v11 = vmax.f32 %v538_v58, %v539_v2  ;;  %v546_v12 = vrot.slane %v545_v3, 2  ;;  %v516_v13 = vmax.f32 %v498_v4, 0.0  ;;  %v501_v14 = vadd.f32 %v751_v40, %v500_v10 }
 0x1d1   : > { %v526_v15 = vmax.f32 %v524_v62, %v525_v6  ;;  %v532_v16 = vrot.slane %v531_v7, 2  ;;  %v564_v17 = vsel %vm284_vm4, %v518_v8, -inf  ;;  %v519_v18 = vmax.f32 %v509_v9, 0.0 }
 0x1d2   : > { %v547_v19 = vmax.f32 %v545_v3, %v546_v12  ;;  %v565_v20 = vrot.slane %v564_v17, 4  ;;  %v550_v21 = vsel %vm284_vm4, %v516_v13, -inf  ;;  %v541_v26 = vrot.slane %v540_v11, 1 }
 0x1d3   : > { %v527_v22 = vrot.slane %v526_v15, 1  ;;  %v533_v23 = vmax.f32 %v531_v7, %v532_v16  ;;  %v551_v24 = vrot.slane %v550_v21, 4  ;;  %v571_v25 = vsel %vm284_vm4, %v519_v18, -inf }
 0x1d4   : > { %v566_v27 = vmax.f32 %v564_v17, %v565_v20  ;;  %v572_v28 = vrot.slane %v571_v25, 4  ;;  %v548_v29 = vrot.slane %v547_v19, 1  ;;  %v517_v32 = vmax.f32 %v501_v14, 0.0 }
 0x1d5   : > { %v534_v30 = vrot.slane %v533_v23, 1  ;;  %v552_v31 = vmax.f32 %v550_v21, %v551_v24  ;;  %v528_v33 = vmax.f32 %v526_v15, %v527_v22  ;;  %v542_v39 = vmax.f32 %v540_v11, %v541_v26 }
 0x1d6   : > { %v573_v34 = vmax.f32 %v571_v25, %v572_v28  ;;  %v567_v36 = vrot.slane %v566_v27, 2  ;;  %v557_v38 = vsel %vm284_vm4, %v517_v32, -inf  ;;  %v549_v42 = vmax.f32 %v547_v19, %v548_v29 }
 0x1d7   : > { %v535_v35 = vmax.f32 %v533_v23, %v534_v30  ;;  %v553_v37 = vrot.slane %v552_v31, 2  ;;  %v558_v41 = vrot.slane %v557_v38, 4 }
 0x1d8   : > { %v574_v40 = vrot.slane %v573_v34, 2  ;;  %v568_v47 = vmax.f32 %v566_v27, %v567_v36 }
 0x1d9   : > { %v587_v43 = vsel %vm586_vm5, %v535_v35, %v528_v33  ;;  %v554_v44 = vmax.f32 %v552_v31, %v553_v37  ;;  %v559_v46 = vmax.f32 %v557_v38, %v558_v41 }
 0x1da   : > { %v589_v45 = vsel %vm588_vm6, %v542_v39, %v587_v43  ;;  %v575_v50 = vmax.f32 %v573_v34, %v574_v40  ;;  %v569_v54 = vrot.slane %v568_v47, 1 }
 0x1db   : > { %v555_v48 = vrot.slane %v554_v44, 1  ;;  %v591_v49 = vsel %vm590_vm7, %v549_v42, %v589_v45  ;;  %v560_v51 = vrot.slane %v559_v46, 2 }
 0x1dc   : > { %v576_v56 = vrot.slane %v575_v50, 1  ;;  %v570_v59 = vmax.f32 %v568_v47, %v569_v54 }
 0x1dd   : > { %v556_v52 = vmax.f32 %v554_v44, %v555_v48  ;;  %v561_v53 = vmax.f32 %v559_v46, %v560_v51 }
 0x1de   : > { %v577_v60 = vmax.f32 %v575_v50, %v576_v56 }
 0x1df   : > { %v593_v55 = vsel %vm592_vm8, %v556_v52, %v591_v49  ;;  %v562_v57 = vrot.slane %v561_v53, 1 }
 0x1e1   : > { %v563_v58 = vmax.f32 %v561_v53, %v562_v57 }
 0x1e3   : > { %v595_v62 = vsel %vm594_vm9, %v563_v58, %v593_v55 }
 0x1e4   : > { %v597_v63 = vsel %vm596_vm10, %v570_v59, %v595_v62 }
 0x1e5   : > { %v599_v0 = vsel %vm598_vm11, %v577_v60, %v597_v63 }
 0x1e6   : > { %v601_v1 = vmax.f32 %v520_v61, %v599_v0 }
 0x1e8   : > { %602 = vst.msk [vmem:[#allocation2] sm:$0xff] %vm284_vm4, %v601_v1 }
 0x1ef   : > { %v606_v2 = vld [vmem:[#allocation2] sm:$0xff] }
 0x1f0   : > { %607 = vxpose.xlu0.b32.start.end [1/1] (short) (narrow) %v606_v2, 32 }
 0x270   : > { %v623_v3 = vpop.trf.xlu0 }
 0x271   : > { %640 = vst.msk [vmem:[%s278_s11] sm:$0xff] %vm639_vm12, %v623_v3 }
 0x274   : > { %v624_v4 = vpop.trf.xlu0 }
 0x275   : > { %641 = vst.msk [vmem:[%s278_s11 + $0x8] sm:$0xff] %vm639_vm12, %v624_v4 }
 0x278   : > { %v625_v5 = vpop.trf.xlu0 }
 0x279   : > { %642 = vst.msk [vmem:[%s278_s11 + $0x10] sm:$0xff] %vm639_vm12, %v625_v5 }
 0x27c   : > { %v626_v6 = vpop.trf.xlu0 }
 0x27d   : > { %643 = vst.msk [vmem:[%s278_s11 + $0x18] sm:$0xff] %vm639_vm12, %v626_v6 }
 0x27e PF: > { %s15_s20 = sadd.s32 1, %s845_s20   ;;  %s951_s18 = smov %s841_s19 }
 0x27f   : > { %p12_p5 = scmp.ge.s32.totalorder %s15_s20, 4   ;;  %s952_s19 = smov %s954_s21 }
 0x281   :  { %14 = sbr.rel (!%p12_p5) target bundleno = 2 (0x2), region = 78 }

</bundles_post_ra>
